<compile_context>
chip_gen: v6e
topology: v6e:2x2x1
jax: 0.10.0
libtpu: 0.0.40
codegen_flags: <defaults>
</compile_context>

<pallas_src>
import functools

import jax
import jax.numpy as jnp
from jax.experimental import pallas as pl
from jax.experimental.pallas import tpu as pltpu


_SUPPORTED_ACTIVATIONS = (
    "elu", "relu", "leaky_relu", "tanh", "sigmoid", "soft_plus")

_VMEM_LIMIT_BYTES = 48 << 20      # scoped VMEM limit we request
_VMEM_BUDGET_BYTES = 36 << 20     # what we let the working set use (headroom)


# ----------------------------- activations ---------------------------------
def _apply_activation(y, activation):
    """Matches the PyTorch ACTIVATION dict semantics (computed in float32)."""
    if activation is None:
        return y
    if activation == "relu":
        return jnp.maximum(y, 0.0)
    if activation == "elu":
        # nn.ELU(alpha=1.0)
        return jnp.where(y > 0, y, jnp.exp(jnp.minimum(y, 0.0)) - 1.0)
    if activation == "leaky_relu":
        # nn.LeakyReLU(negative_slope=0.2)
        return jnp.where(y > 0, y, 0.2 * y)
    if activation == "tanh":
        return jnp.tanh(y)
    if activation == "sigmoid":
        return jax.nn.sigmoid(y)
    if activation == "soft_plus":
        # nn.Softplus(beta=1, threshold=20)
        return jnp.where(y > 20.0, y, jnp.log1p(jnp.exp(jnp.minimum(y, 20.0))))
    raise IOError("The activation is not supported now!")


def _round_up(n, m):
    return ((n + m - 1) // m) * m


# ----------------------------- fused kernel ---------------------------------
def _mlp_fused_kernel(*refs, activations):
    """Fused MLP on one (tile_m, *) row tile.

    refs = (x_ref, w0_ref, b0_ref, w1_ref, b1_ref, ..., o_ref)
      x_ref : (tile_m, d_in_p)   bf16   (row tile of the input)
      wi    : (in_p_i, out_p_i)  bf16   (pre-transposed, zero-padded weights)
      bi    : (1, out_p_i)       f32    (zero-padded bias)
      o_ref : (tile_m, d_out_p)  f32
    Intermediate activations stay in VMEM/vregs — they never hit HBM.
    """
    x_ref = refs[0]
    o_ref = refs[-1]
    wb_refs = refs[1:-1]
    n_layers = len(wb_refs) // 2

    h = x_ref[...]                                   # bf16 MXU operand
    for i in range(n_layers):
        w = wb_refs[2 * i][...]                      # (in_p, out_p) bf16
        b = wb_refs[2 * i + 1][...]                  # (1, out_p)    f32
        y = jnp.dot(h, w, preferred_element_type=jnp.float32) + b
        y = _apply_activation(y, activations[i])     # f32 elementwise path
        if i + 1 < n_layers:
            h = y.astype(jnp.bfloat16)               # feed next layer's MXU
        else:
            o_ref[...] = y.astype(o_ref.dtype)


def _pick_row_tile(requested, rows_p, d_in_p, d_out_p, hidden_p, wb_bytes):
    """Largest row tile (<= requested, multiple of 8) whose double-buffered
    working set fits the VMEM budget."""
    tile = min(_round_up(requested, 8), rows_p)
    tile = max(8, (tile // 8) * 8)
    while tile > 8:
        io_bytes = 2 * (tile * d_in_p * 2) + 2 * (tile * d_out_p * 4)
        act_bytes = tile * max(hidden_p + [d_out_p]) * 4 * 2  # live intermediates
        if wb_bytes + io_bytes + act_bytes <= _VMEM_BUDGET_BYTES:
            break
        tile //= 2
        tile = max(8, (tile // 8) * 8)
    return tile


def mlp_forward(x, weights, biases, activations, out_size, row_tile=512):
    """Run the fused MLP kernel on x of shape (N, d_in) (float32).

    weights[i]: padded bf16 (in_p_i, out_p_i); biases[i]: padded f32 (1, out_p_i).
    """
    n, d_in = x.shape
    d_in_p = weights[0].shape[0]
    d_out_p = weights[-1].shape[1]
    hidden_p = [w.shape[1] for w in weights]

    wb_bytes = sum(int(w.size) * 2 for w in weights) + \
        sum(int(b.size) * 4 for b in biases)
    wb_bytes *= 2  # conservative: assume weight tiles are double-buffered too

    # Row tiling: tile must be a multiple of 8 (sublane); rows padded to a
    # multiple of the tile so the grid divides evenly.
    rows_p = _round_up(max(n, 8), 8)
    tile_m = _pick_row_tile(row_tile, rows_p, d_in_p, d_out_p, hidden_p,
                            wb_bytes)
    rows_p = _round_up(rows_p, tile_m)

    # Zero-pad the input to (rows_p, d_in_p) and cast the MXU operand to bf16.
    x_p = jnp.zeros((rows_p, d_in_p), jnp.bfloat16)
    x_p = x_p.at[:n, :d_in].set(x.astype(jnp.bfloat16))

    grid = (rows_p // tile_m,)

    in_specs = [pl.BlockSpec((tile_m, d_in_p), lambda i: (i, 0))]
    operands = [x_p]
    for w, b in zip(weights, biases):
        # Constant block index across the grid -> weight tiles stay
        # VMEM-resident (no per-step re-DMA).
        in_specs.append(pl.BlockSpec(w.shape, lambda i: (0, 0)))
        in_specs.append(pl.BlockSpec(b.shape, lambda i: (0, 0)))
        operands.append(w)
        operands.append(b)

    kernel = functools.partial(_mlp_fused_kernel,
                               activations=tuple(activations))

    out_p = pl.pallas_call(
        kernel,
        out_shape=jax.ShapeDtypeStruct((rows_p, d_out_p), x.dtype),
        grid=grid,
        in_specs=in_specs,
        out_specs=pl.BlockSpec((tile_m, d_out_p), lambda i: (i, 0)),
        compiler_params=pltpu.CompilerParams(
            dimension_semantics=("parallel",),   # shard row tiles across TCs
            vmem_limit_bytes=_VMEM_LIMIT_BYTES,
        ),
    )(*operands)

    # Strip row / lane padding in the wrapper (cheap XLA slice).
    return out_p[:n, :out_size]


# ------------------------------- MLP module ----------------------------------
class MLP:
    """JAX/Pallas mirror of the PyTorch MLP module (forward pass)."""

    def __init__(self, input_size, output_size_list, activation=None,
                 last_activation=None, *, key=None, dtype=jnp.float32,
                 row_tile=512):
        for act in (activation, last_activation):
            if act is not None and act not in _SUPPORTED_ACTIVATIONS:
                raise IOError("The activation is not supported now!")

        self.input_size = input_size
        self.output_size_list = list(output_size_list)
        self.activation = activation
        self.last_activation = last_activation
        self.row_tile = row_tile

        if key is None:
            key = jax.random.PRNGKey(0)

        sizes = [input_size] + self.output_size_list
        n_layers = len(self.output_size_list)
        # Per-layer activation: `activation` between hidden layers,
        # `last_activation` after the final Linear (PyTorch module semantics).
        self.acts = [activation] * (n_layers - 1) + [last_activation]

        self.params = []     # unpadded f32 PyTorch-style (W (out,in), b (out,))
        self.w_packed = []   # padded, pre-transposed bf16 (in_p, out_p)
        self.b_packed = []   # padded f32 (1, out_p)
        for i in range(1, len(sizes)):
            d_in, d_out = sizes[i - 1], sizes[i]
            key, kw, kb = jax.random.split(key, 3)
            # Deterministic init mimicking PyTorch nn.Linear default:
            # U(-1/sqrt(in), 1/sqrt(in)) for both W and b.
            bound = 1.0 / (d_in ** 0.5)
            w = jax.random.uniform(kw, (d_out, d_in), dtype, -bound, bound)
            b = jax.random.uniform(kb, (d_out,), dtype, -bound, bound)
            self.params.append((w, b))

            in_p = _round_up(d_in, 128)
            out_p = _round_up(d_out, 128)
            wp = jnp.zeros((in_p, out_p), jnp.bfloat16)
            wp = wp.at[:d_in, :d_out].set(w.T.astype(jnp.bfloat16))
            bp = jnp.zeros((1, out_p), jnp.float32)
            bp = bp.at[0, :d_out].set(b.astype(jnp.float32))
            self.w_packed.append(wp)
            self.b_packed.append(bp)

    def __call__(self, x):
        # x: (..., input_size) — flatten leading dims, apply fused MLP, restore.
        lead = x.shape[:-1]
        h = x.reshape(-1, x.shape[-1])
        out = mlp_forward(h, self.w_packed, self.b_packed, self.acts,
                          self.output_size_list[-1], row_tile=self.row_tile)
        return out.reshape(*lead, out.shape[-1])


# Pure-JAX reference matching the kernel's numerics (bf16 MXU operands,
# f32 accumulation / bias / activation).
def _mlp_ref(mlp, x):
    lead = x.shape[:-1]
    h = x.reshape(-1, x.shape[-1])
    n_layers = len(mlp.params)
    for i, (w, b) in enumerate(mlp.params):
        y = jnp.dot(h.astype(jnp.bfloat16), w.T.astype(jnp.bfloat16),
                    preferred_element_type=jnp.float32) + b.astype(jnp.float32)
        act = mlp.activation if i < n_layers - 1 else mlp.last_activation
        h = _apply_activation(y, act)
    return h.reshape(*lead, h.shape[-1]).astype(x.dtype)


if __name__ == "__main__":
    key = jax.random.PRNGKey(0)
    kx, kp = jax.random.split(key)

    batch, seq, input_size = 2, 8, 32
    output_size_list = [64, 64, 16]

    x = jax.random.normal(kx, (batch, seq, input_size), jnp.float32)

    mlp = MLP(input_size, output_size_list,
              activation="relu", last_activation="tanh", key=kp)

    out = mlp(x)
    out = jax.block_until_ready(out)

    ref = _mlp_ref(mlp, x)
    assert out.shape == (batch, seq, output_size_list[-1]), out.shape
    assert jnp.allclose(out, ref, atol=2e-3, rtol=2e-3), \
        float(jnp.max(jnp.abs(out - ref)))

    print("KERNEL_OK")
</pallas_src>

<mosaic_0001>
module attributes {stable_mosaic.version = 11 : i64} {
  func.func @_mlp_fused_kernel(%arg0: i32, %arg1: memref<16x128xbf16, #tpu.memory_space<vmem>>, %arg2: memref<128x128xbf16, #tpu.memory_space<vmem>>, %arg3: memref<1x128xf32, #tpu.memory_space<vmem>>, %arg4: memref<128x128xbf16, #tpu.memory_space<vmem>>, %arg5: memref<1x128xf32, #tpu.memory_space<vmem>>, %arg6: memref<128x128xbf16, #tpu.memory_space<vmem>>, %arg7: memref<1x128xf32, #tpu.memory_space<vmem>>, %arg8: memref<16x128xf32, #tpu.memory_space<vmem>>) attributes {dimension_semantics = [#tpu.dimension_semantics<parallel>], iteration_bounds = array<i64: 1>, scalar_prefetch = 0 : i64, scratch_operands = 0 : i64, tpu.core_type = #tpu.core_type<tc>, window_params = [{transform_indices = @transform_0, window_bounds = array<i64: 16, 128>}, {pipeline_mode = #tpu.pipeline_mode<synchronous>, transform_indices = @transform_1, window_bounds = array<i64: 128, 128>}, {pipeline_mode = #tpu.pipeline_mode<synchronous>, transform_indices = @transform_2, window_bounds = array<i64: 1, 128>}, {pipeline_mode = #tpu.pipeline_mode<synchronous>, transform_indices = @transform_3, window_bounds = array<i64: 128, 128>}, {pipeline_mode = #tpu.pipeline_mode<synchronous>, transform_indices = @transform_4, window_bounds = array<i64: 1, 128>}, {pipeline_mode = #tpu.pipeline_mode<synchronous>, transform_indices = @transform_5, window_bounds = array<i64: 128, 128>}, {pipeline_mode = #tpu.pipeline_mode<synchronous>, transform_indices = @transform_6, window_bounds = array<i64: 1, 128>}, {transform_indices = @transform_7, window_bounds = array<i64: 16, 128>}]} {
    %c0 = arith.constant 0 : index
    %c0_0 = arith.constant 0 : index
    %0 = vector.load %arg1[%c0, %c0_0] : memref<16x128xbf16, #tpu.memory_space<vmem>>, vector<16x128xbf16>
    %c0_1 = arith.constant 0 : index
    %c0_2 = arith.constant 0 : index
    %1 = vector.load %arg2[%c0_1, %c0_2] : memref<128x128xbf16, #tpu.memory_space<vmem>>, vector<128x128xbf16>
    %c0_3 = arith.constant 0 : index
    %c0_4 = arith.constant 0 : index
    %2 = vector.load %arg3[%c0_3, %c0_4] : memref<1x128xf32, #tpu.memory_space<vmem>>, vector<1x128xf32>
    %cst = arith.constant dense<0.000000e+00> : vector<16x128xf32>
    %3 = tpu.matmul %0, %1, %cst {dimension_numbers = #tpu.dot_dimension_numbers<[1], [0], [0], [1], [0, 0, 1, 1], [], []>} : vector<16x128xbf16>, vector<128x128xbf16>, vector<16x128xf32> -> vector<16x128xf32>
    %4 = vector.broadcast %2 : vector<1x128xf32> to vector<16x128xf32>
    %5 = arith.addf %3, %4 : vector<16x128xf32>
    %cst_5 = arith.constant 0.000000e+00 : f32
    %6 = vector.broadcast %cst_5 : f32 to vector<16x128xf32>
    %7 = arith.maximumf %5, %6 : vector<16x128xf32>
    %8 = arith.truncf %7 : vector<16x128xf32> to vector<16x128xbf16>
    %c0_6 = arith.constant 0 : index
    %c0_7 = arith.constant 0 : index
    %9 = vector.load %arg4[%c0_6, %c0_7] : memref<128x128xbf16, #tpu.memory_space<vmem>>, vector<128x128xbf16>
    %c0_8 = arith.constant 0 : index
    %c0_9 = arith.constant 0 : index
    %10 = vector.load %arg5[%c0_8, %c0_9] : memref<1x128xf32, #tpu.memory_space<vmem>>, vector<1x128xf32>
    %cst_10 = arith.constant dense<0.000000e+00> : vector<16x128xf32>
    %11 = tpu.matmul %8, %9, %cst_10 {dimension_numbers = #tpu.dot_dimension_numbers<[1], [0], [0], [1], [0, 0, 1, 1], [], []>} : vector<16x128xbf16>, vector<128x128xbf16>, vector<16x128xf32> -> vector<16x128xf32>
    %12 = vector.broadcast %10 : vector<1x128xf32> to vector<16x128xf32>
    %13 = arith.addf %11, %12 : vector<16x128xf32>
    %cst_11 = arith.constant 0.000000e+00 : f32
    %14 = vector.broadcast %cst_11 : f32 to vector<16x128xf32>
    %15 = arith.maximumf %13, %14 : vector<16x128xf32>
    %16 = arith.truncf %15 : vector<16x128xf32> to vector<16x128xbf16>
    %c0_12 = arith.constant 0 : index
    %c0_13 = arith.constant 0 : index
    %17 = vector.load %arg6[%c0_12, %c0_13] : memref<128x128xbf16, #tpu.memory_space<vmem>>, vector<128x128xbf16>
    %c0_14 = arith.constant 0 : index
    %c0_15 = arith.constant 0 : index
    %18 = vector.load %arg7[%c0_14, %c0_15] : memref<1x128xf32, #tpu.memory_space<vmem>>, vector<1x128xf32>
    %cst_16 = arith.constant dense<0.000000e+00> : vector<16x128xf32>
    %19 = tpu.matmul %16, %17, %cst_16 {dimension_numbers = #tpu.dot_dimension_numbers<[1], [0], [0], [1], [0, 0, 1, 1], [], []>} : vector<16x128xbf16>, vector<128x128xbf16>, vector<16x128xf32> -> vector<16x128xf32>
    %20 = vector.broadcast %18 : vector<1x128xf32> to vector<16x128xf32>
    %21 = arith.addf %19, %20 : vector<16x128xf32>
    %22 = math.tanh %21 : vector<16x128xf32>
    %c0_17 = arith.constant 0 : index
    %c0_18 = arith.constant 0 : index
    %23 = vector.load %arg8[%c0_17, %c0_18] : memref<16x128xf32, #tpu.memory_space<vmem>>, vector<16x128xf32>
    tpu.vector_store %arg8[%c0_17, %c0_18], %22 {strides = array<i32>} : memref<16x128xf32, #tpu.memory_space<vmem>>, vector<16x128xf32>,
    return
  }
  func.func @transform_0(%arg0: i32) -> (i32, i32) {
    %c0_i32 = arith.constant 0 : i32
    %c0_i32_0 = arith.constant 0 : i32
    return %arg0, %c0_i32 : i32, i32
  }
  func.func @transform_1(%arg0: i32) -> (i32, i32) {
    %c0_i32 = arith.constant 0 : i32
    %c0_i32_0 = arith.constant 0 : i32
    %c0_i32_1 = arith.constant 0 : i32
    return %c0_i32, %c0_i32_0 : i32, i32
  }
  func.func @transform_2(%arg0: i32) -> (i32, i32) {
    %c0_i32 = arith.constant 0 : i32
    %c0_i32_0 = arith.constant 0 : i32
    %c0_i32_1 = arith.constant 0 : i32
    return %c0_i32, %c0_i32_0 : i32, i32
  }
  func.func @transform_3(%arg0: i32) -> (i32, i32) {
    %c0_i32 = arith.constant 0 : i32
    %c0_i32_0 = arith.constant 0 : i32
    %c0_i32_1 = arith.constant 0 : i32
    return %c0_i32, %c0_i32_0 : i32, i32
  }
  func.func @transform_4(%arg0: i32) -> (i32, i32) {
    %c0_i32 = arith.constant 0 : i32
    %c0_i32_0 = arith.constant 0 : i32
    %c0_i32_1 = arith.constant 0 : i32
    return %c0_i32, %c0_i32_0 : i32, i32
  }
  func.func @transform_5(%arg0: i32) -> (i32, i32) {
    %c0_i32 = arith.constant 0 : i32
    %c0_i32_0 = arith.constant 0 : i32
    %c0_i32_1 = arith.constant 0 : i32
    return %c0_i32, %c0_i32_0 : i32, i32
  }
  func.func @transform_6(%arg0: i32) -> (i32, i32) {
    %c0_i32 = arith.constant 0 : i32
    %c0_i32_0 = arith.constant 0 : i32
    %c0_i32_1 = arith.constant 0 : i32
    return %c0_i32, %c0_i32_0 : i32, i32
  }
  func.func @transform_7(%arg0: i32) -> (i32, i32) {
    %c0_i32 = arith.constant 0 : i32
    %c0_i32_0 = arith.constant 0 : i32
    return %arg0, %c0_i32 : i32, i32
  }
}

</mosaic_0001>

<bundles_post_ra>
// kernel: tpu_custom_call.1
= control target key start
LH: loop header
LB: loop body
LE: loop exit
PB: predicated region body
PF: predicated region fallthrough
CT: control target
= control target key end

     0   :  { %12 = vsyncpa [#allocation3], 0  ;;  %s836_s0 = inlined_call_operand.hbm [shape: bf16[16,128], index: 0, kind: input, shape index: {}]   ;;  %s837_s1 = inlined_call_operand.hbm [shape: bf16[128,128], index: 1, kind: input, shape index: {}]   ;;  %s838_s2 = inlined_call_operand.vmem [shape: f32[1,128], index: 2, kind: input, shape index: {}]   ;;  %s839_s3 = inlined_call_operand.hbm [shape: bf16[128,128], index: 3, kind: input, shape index: {}]   ;;  %s840_s4 = inlined_call_operand.vmem [shape: f32[1,128], index: 4, kind: input, shape index: {}]   ;;  %s841_s5 = inlined_call_operand.hbm [shape: bf16[128,128], index: 5, kind: input, shape index: {}]   ;;  %s842_s6 = inlined_call_operand.vmem [shape: f32[1,128], index: 6, kind: input, shape index: {}]   ;;  %s843_s7 = inlined_call_operand.hbm [shape: f32[16,128], index: 7, kind: output, shape index: {}]  }
   0x1   :  { %13 = vsyncpa [#allocation6], 0 }
   0x2   :  { %14 = vsyncpa [#allocation9], 0 }
   0x3   :  { %15 = vsyncpa [#allocation4], 0  ;;  %s719_s24 = smov [#allocation5]   ;;  %s720_s26 = smov [#allocation2]  }
   0x4   :  { %s33_s25 = sshll.u32 %s719_s24, 4  ;;  %s21_s27 = sshll.u32 %s720_s26, 4  ;;  %s34_s25 = int_to_ptr.vmem [resolvable:$true] %s33_s25  ;;  %s22_s27 = int_to_ptr.vmem [resolvable:$true] %s21_s27 }
   0x5   :  { %s619_s28 = scalar_lea.vmem %s34_s25, 1024  ;;  %p624_p1 = scmp.lt.s32.totalorder %s34_s25, %s34_s25 }
   0x6   :  { %p620_p0 = scmp.ne.s32.totalorder %s34_s25, %s619_s28  ;;  %p625_p2 = scmp.lt.s32.totalorder %s619_s28, %s619_s28 }
   0x8   :  { %p626_p3 = por %p625_p2, %p624_p1 }
   0xa   :  { %p627_p4 = pnand %p626_p3, %p620_p0 }
   0xc   :  { %630 = shalt.err (!%p627_p4)
}
   0xd   :  { %s721_s29 = smov 64   ;;  %s722_s30 = smov 4  }
   0xe   :  { %39 = dma.hbm_to_vmem [thread:$0]  %s837_s1, 1024, %s34_s25, [#allocation6], %s721_s29, %s721_s29, %s722_s30  }
   0xf   :  { %s639_s10 = scalar_lea.vmem %s22_s27, 128  ;;  %p644_p6 = scmp.lt.s32.totalorder %s22_s27, %s22_s27 }
  0x10   :  { %p640_p5 = scmp.ne.s32.totalorder %s22_s27, %s639_s10  ;;  %p645_p7 = scmp.lt.s32.totalorder %s639_s10, %s639_s10 }
  0x12   :  { %p646_p8 = por %p645_p7, %p644_p6 }
  0x14   :  { %p647_p9 = pnand %p646_p8, %p640_p5 }
  0x16   :  { %650 = shalt.err (!%p647_p9)
}
  0x17   :  { %27 = dma.hbm_to_vmem [thread:$0]  %s836_s0, 128, %s22_s27, [#allocation3], %s721_s29, %s721_s29, %s722_s30  }
  0x18   :  { %s723_s13 = smov [#allocation7]   ;;  %s724_s15 = smov [#allocation8]  }
  0x19   :  { %s47_s14 = sshll.u32 %s723_s13, 4  ;;  %s61_s16 = sshll.u32 %s724_s15, 4  ;;  %s48_s14 = int_to_ptr.vmem [resolvable:$true] %s47_s14  ;;  %s62_s16 = int_to_ptr.vmem [resolvable:$true] %s61_s16 }
  0x1a   :  { %s659_s1 = scalar_lea.vmem %s48_s14, 1024  ;;  %p664_p11 = scmp.lt.s32.totalorder %s48_s14, %s48_s14 }
  0x1b   :  { %p660_p10 = scmp.ne.s32.totalorder %s48_s14, %s659_s1  ;;  %p665_p12 = scmp.lt.s32.totalorder %s659_s1, %s659_s1 }
  0x1d   :  { %p666_p13 = por %p665_p12, %p664_p11 }
  0x1f   :  { %p667_p0 = pnand %p666_p13, %p660_p10 }
  0x21   :  { %670 = shalt.err (!%p667_p0)
}
  0x22   :  { %53 = dma.hbm_to_vmem [thread:$0]  %s839_s3, 1024, %s48_s14, [#allocation6], %s721_s29, %s721_s29, %s722_s30  }
  0x23   :  { %s679_s0 = scalar_lea.vmem %s62_s16, 1024  ;;  %p684_p2 = scmp.lt.s32.totalorder %s62_s16, %s62_s16 }
  0x24   :  { %p680_p1 = scmp.ne.s32.totalorder %s62_s16, %s679_s0  ;;  %p685_p3 = scmp.lt.s32.totalorder %s679_s0, %s679_s0 }
  0x26   :  { %p686_p4 = por %p685_p3, %p684_p2 }
  0x28   :  { %p687_p5 = pnand %p686_p4, %p680_p1 }
  0x2a   :  { %690 = shalt.err (!%p687_p5)
}
  0x2b   :  { %67 = dma.hbm_to_vmem [thread:$0]  %s841_s5, 1024, %s62_s16, [#allocation9], %s721_s29, %s721_s29, %s722_s30  }
  0x2c   :  { %711 = dma.done.wait [#allocation3], 128  }
  0x2d   :  { %712 = vsyncadd [#allocation3], 4294967168 }
  0x2e   :  { %713 = dma.done.wait [#allocation6], 2048  }
  0x2f   :  { %714 = vsyncadd [#allocation6], 4294965248 }
  0x30   :  { %715 = dma.done.wait [#allocation9], 1024  }
  0x31   :  { %716 = vsyncadd [#allocation9], 4294966272  ;;  %v725_v0 = vmov 0.0   ;;  %vm726_vm0 = vmmov 0   ;;  %v582_v1 = vld [vmem:[#allocation5 + $0x38] sm:$0xff]   ;;  %v583_v2 = vld [vmem:[#allocation5 + $0x30] sm:$0xff]  }
  0x32   :  { %511 = vmatprep.subr.bf16.mxu0 %v725_v0  ;;  %527 = vmatprep.mubr.msk.bf16.mxu0 %vm726_vm0, %v725_v0  ;;  %v584_v3 = vld [vmem:[#allocation5 + $0x28] sm:$0xff]   ;;  %v591_v4 = vld [vmem:[#allocation7 + $0x38] sm:$0xff]   ;;  %v585_v5 = vld [vmem:[#allocation5 + $0x20] sm:$0xff]  }
  0x33   :  { %531 = vmatprep.subr.bf16.mxu1 %v725_v0  ;;  %547 = vmatprep.mubr.msk.bf16.mxu1 %vm726_vm0, %v725_v0  ;;  %v592_v6 = vld [vmem:[#allocation7 + $0x30] sm:$0xff]   ;;  %v586_v7 = vld [vmem:[#allocation5 + $0x18] sm:$0xff]   ;;  %v593_v8 = vld [vmem:[#allocation7 + $0x28] sm:$0xff]  }
  0x34   :  { %512 = vmatpush3.bf16.msra.mxu0 %v582_v1  ;;  %532 = vmatpush3.bf16.msra.mxu1 %v591_v4  ;;  %v587_v9 = vld [vmem:[#allocation5 + $0x10] sm:$0xff]   ;;  %v594_v10 = vld [vmem:[#allocation7 + $0x20] sm:$0xff]   ;;  %v588_v11 = vld [vmem:[#allocation5 + $0x8] sm:$0xff]  }
  0x35   :  { %513 = vmatprep.subr.bf16.mxu0 %v725_v0  ;;  %533 = vmatprep.subr.bf16.mxu1 %v725_v0  ;;  %v595_v12 = vld [vmem:[#allocation7 + $0x18] sm:$0xff]   ;;  %v589_v13 = vld [vmem:[#allocation5] sm:$0xff]   ;;  %v596_v15 = vld [vmem:[#allocation7 + $0x10] sm:$0xff]  }
  0x36   :  { %v590_v14 = vld [vmem:[#allocation2] sm:$0xff]   ;;  %v597_v16 = vld [vmem:[#allocation7 + $0x8] sm:$0xff]   ;;  %v598_v17 = vld [vmem:[#allocation7] sm:$0xff]  }
  0x37   :  { %v599_v18 = vld [vmem:[#allocation8 + $0x38] sm:$0xff]   ;;  %v600_v19 = vld [vmem:[#allocation8 + $0x30] sm:$0xff]   ;;  %v601_v20 = vld [vmem:[#allocation8 + $0x28] sm:$0xff]  }
  0x38   :  { %514 = vmatpush3.bf16.msra.mxu0 %v583_v2  ;;  %534 = vmatpush3.bf16.msra.mxu1 %v592_v6  ;;  %v602_v21 = vld [vmem:[#allocation8 + $0x20] sm:$0xff]   ;;  %v603_v22 = vld [vmem:[#allocation8 + $0x18] sm:$0xff]   ;;  %v604_v33 = vld [vmem:[#allocation8 + $0x10] sm:$0xff]  }
  0x39   :  { %515 = vmatprep.subr.bf16.mxu0 %v725_v0  ;;  %535 = vmatprep.subr.bf16.mxu1 %v725_v0  ;;  %v456_v23 = vld [vmem:[%s838_s2] ss:$0 sm:$0xff]  ;;  %v605_v34 = vld [vmem:[#allocation8 + $0x8] sm:$0xff]   ;;  %v606_v35 = vld [vmem:[#allocation8] sm:$0xff]  }
  0x3a   :  { %v466_v36 = vld [vmem:[%s840_s4] ss:$0 sm:$0xff]  ;;  %s727_s4 = smov [#allocation10]  }
  0x3b   :  { %v475_v46 = vld [vmem:[%s842_s6] ss:$0 sm:$0xff]  ;;  %s442_s24 = sshll.u32 %s727_s4, 4  ;;  %s443_s24 = int_to_ptr.vmem [resolvable:$true] %s442_s24 }
  0x3c   :  { %516 = vmatpush3.bf16.msra.mxu0 %v584_v3  ;;  %536 = vmatpush3.bf16.msra.mxu1 %v593_v8  ;;  %s691_s25 = scalar_lea.vmem %s443_s24, 256  ;;  %p696_p7 = scmp.lt.s32.totalorder %s443_s24, %s443_s24 }
  0x3d   :  { %517 = vmatprep.subr.bf16.mxu0 %v725_v0  ;;  %537 = vmatprep.subr.bf16.mxu1 %v725_v0  ;;  %p692_p6 = scmp.ne.s32.totalorder %s443_s24, %s691_s25  ;;  %p697_p8 = scmp.lt.s32.totalorder %s691_s25, %s691_s25 }
  0x3f   :  { %p698_p9 = por %p697_p8, %p696_p7 }
  0x40   :  { %518 = vmatpush3.bf16.msra.mxu0 %v585_v5  ;;  %538 = vmatpush3.bf16.msra.mxu1 %v594_v10 }
  0x41   :  { %519 = vmatprep.subr.bf16.mxu0 %v725_v0  ;;  %539 = vmatprep.subr.bf16.mxu1 %v725_v0  ;;  %p699_p10 = pnand %p698_p9, %p692_p6 }
  0x44   :  { %520 = vmatpush3.bf16.msra.mxu0 %v586_v7  ;;  %540 = vmatpush3.bf16.msra.mxu1 %v595_v12 }
  0x45   :  { %521 = vmatprep.subr.bf16.mxu0 %v725_v0  ;;  %541 = vmatprep.subr.bf16.mxu1 %v725_v0 }
  0x48   :  { %522 = vmatpush3.bf16.msra.mxu0 %v587_v9  ;;  %542 = vmatpush3.bf16.msra.mxu1 %v596_v15 }
  0x49   :  { %523 = vmatprep.subr.bf16.mxu0 %v725_v0  ;;  %543 = vmatprep.subr.bf16.mxu1 %v725_v0 }
  0x4c   :  { %524 = vmatpush3.bf16.msra.mxu0 %v588_v11  ;;  %544 = vmatpush3.bf16.msra.mxu1 %v597_v16 }
  0x4d   :  { %525 = vmatprep.subr.bf16.mxu0 %v725_v0  ;;  %545 = vmatprep.subr.bf16.mxu1 %v725_v0 }
  0x50   :  { %526 = vmatpush3.bf16.msra.mxu0 %v589_v13  ;;  %546 = vmatpush3.bf16.msra.mxu1 %v598_v17 }
  0x51   :  { %551 = vmatprep.subr.bf16.mxu0 %v725_v0 }
  0x53   :  { %528 = vmatmul.mubr.bf16.vlgmr.msra.gmra.mxu0 %v590_v14 }
  0x54   :  { %567 = vmatprep.mubr.msk.bf16.mxu0 %vm726_vm0, %v725_v0  ;;  %552 = vmatpush3.bf16.msra.mxu0 %v599_v18 }
  0x55   :  { %553 = vmatprep.subr.bf16.mxu0 %v725_v0 }
  0x58   :  { %554 = vmatpush3.bf16.msra.mxu0 %v600_v19 }
  0x59   :  { %555 = vmatprep.subr.bf16.mxu0 %v725_v0 }
  0x5c   :  { %556 = vmatpush3.bf16.msra.mxu0 %v601_v20 }
  0x5d   :  { %557 = vmatprep.subr.bf16.mxu0 %v725_v0 }
  0x60   :  { %558 = vmatpush3.bf16.msra.mxu0 %v602_v21 }
  0x61   :  { %559 = vmatprep.subr.bf16.mxu0 %v725_v0 }
  0x64   :  { %560 = vmatpush3.bf16.msra.mxu0 %v603_v22 }
  0x65   :  { %561 = vmatprep.subr.bf16.mxu0 %v725_v0 }
  0x68   :  { %562 = vmatpush3.bf16.msra.mxu0 %v604_v33 }
  0x69   :  { %563 = vmatprep.subr.bf16.mxu0 %v725_v0 }
  0x6c   :  { %564 = vmatpush3.bf16.msra.mxu0 %v605_v34 }
  0x6d   :  { %565 = vmatprep.subr.bf16.mxu0 %v725_v0 }
  0x70   :  { %566 = vmatpush3.bf16.msra.mxu0 %v606_v35 }
 0x113   :  { %v196_v24 = vpop.f32.mrf.mxu0 }
 0x114   :  { %v197_v26 = vadd.f32 %v456_v23, %v196_v24 }
 0x115   :  { %v529_v25 = vpop.f32.mrf.mxu0 }
 0x116   :  { %v203_v30 = vmax.f32 %v197_v26, 0.0 }
 0x117   :  { %v199_v27 = vpop.f32.mrf.mxu0 }
 0x118   :  { %v200_v28 = vadd.f32 %v456_v23, %v199_v27 }
 0x119   :  { %v530_v29 = vpop.f32.mrf.mxu0 }
 0x11a   :  { %v204_v31 = vmax.f32 %v200_v28, 0.0 }
 0x11c   :  { %v205_v32 = vpack.c.bf16 %v204_v31, %v203_v30 }
 0x11e   :  { %548 = vmatmul.mubr.bf16.vlgmr.msra.gmra.mxu1 %v205_v32 }
 0x1de   :  { %v311_v37 = vpop.f32.mrf.mxu1 }
 0x1df   :  { %v312_v39 = vadd.f32 %v466_v36, %v311_v37 }
 0x1e0   :  { %v549_v38 = vpop.f32.mrf.mxu1 }
 0x1e1   :  { %v318_v43 = vmax.f32 %v312_v39, 0.0 }
 0x1e2   :  { %v314_v40 = vpop.f32.mrf.mxu1 }
 0x1e3   :  { %v315_v41 = vadd.f32 %v466_v36, %v314_v40 }
 0x1e4   :  { %v550_v42 = vpop.f32.mrf.mxu1 }
 0x1e5   :  { %v319_v44 = vmax.f32 %v315_v41, 0.0 }
 0x1e7   :  { %v320_v45 = vpack.c.bf16 %v319_v44, %v318_v43 }
 0x1e9   :  { %568 = vmatmul.mubr.bf16.vlgmr.msra.gmra.mxu0 %v320_v45 }
 0x2a9   :  { %v426_v47 = vpop.f32.mrf.mxu0 }
 0x2aa   :  { %v427_v48 = vadd.f32 %v475_v46, %v426_v47 }
 0x2ab   :  { %v569_v49 = vpop.f32.mrf.mxu0 }
 0x2ac   :  { %607 = vtanh.f32 %v427_v48 }
 0x2ad   :  { %v429_v50 = vpop.f32.mrf.mxu0 }
 0x2ae   :  { %v430_v51 = vadd.f32 %v475_v46, %v429_v50 }
 0x2af   :  { %v570_v52 = vpop.f32.mrf.mxu0 }
 0x2b0   :  { %609 = vtanh.f32 %v430_v51 }
 0x2b9   :  { %v608_v53 = vpop.eup %607 }
 0x2ba   :  { %435 = vst [vmem:[#allocation10] sm:$0xff] %v608_v53 }
 0x2bd   :  { %v610_v54 = vpop.eup %609 }
 0x2be   :  { %436 = vst [vmem:[#allocation10 + $0x8] sm:$0xff] %v610_v54 }
 0x2bf   :  { %702 = shalt.err (!%p699_p10)
}
 0x2c0   :  { %s728_s6 = smov 128   ;;  %s729_s26 = smov 8  }
 0x2c1   :  { %448 = dma.vmem_to_hbm [thread:$0]  %s443_s24, 256, %s843_s7, [#allocation4], %s728_s6, %s728_s6, %s729_s26  }
 0x2c2   :  { %717 = dma.done.wait [#allocation4], 256  }
 0x2c3   :  { %718 = vsyncadd [#allocation4], 4294967040 }
 0x2c4   :  { %452 = vsyncpa [#allocation3], 1 }
 0x2c5   :  { %453 = vsyncpa [#allocation6], 1 }
 0x2c6   :  { %454 = vsyncpa [#allocation9], 1 }
 0x2c7   :  { %455 = vsyncpa [#allocation4], 1 }

</bundles_post_ra>
